<compile_context>
chip_gen: v7x
topology: tpu7x:2x2x1
jax: 0.10.0
libtpu: 0.0.40
codegen_flags: <defaults>
</compile_context>

<pallas_src>
import functools
import math

import jax
import jax.numpy as jnp
import numpy as np
from jax.experimental import pallas as pl
from jax.experimental.pallas import tpu as pltpu


# ----------------------------------------------------------------------------
# One-time parameter preparation (hoisted out of the per-call wrapper)
# ----------------------------------------------------------------------------
def prepare_cross_attention_params(params, num_heads, compute_dtype=jnp.float32):
    """Fold the softmax scale into Wq/bq, fuse Wk|Wv, cast weights once.

    params = {"q": (wq, bq), "k": (wk, bk), "v": (wv, bv)} with w: (din, dout)
    and b: (dout,) or (1, dout).  compute_dtype is the MXU operand dtype
    (jnp.bfloat16 recommended on v6e/v7x); biases stay f32 because they are
    added to the f32 accumulators, and softmax math is always f32.
    """
    wq, bq = params["q"]
    wk, bk = params["k"]
    wv, bv = params["v"]
    H = wq.shape[1]
    if H % num_heads != 0:
        raise ValueError("hidden size must be a multiple of num_heads")
    scale = 1.0 / math.sqrt(H // num_heads)

    def as_bias(b):
        return jnp.asarray(b, jnp.float32).reshape(1, -1)

    return {
        "wq": (jnp.asarray(wq, jnp.float32) * scale).astype(compute_dtype),
        "bq": as_bias(bq) * scale,
        "wkv": jnp.concatenate(
            [jnp.asarray(wk, jnp.float32), jnp.asarray(wv, jnp.float32)],
            axis=1).astype(compute_dtype),                        # (Cd, 2H)
        "bkv": jnp.concatenate([as_bias(bk), as_bias(bv)], axis=1),  # (1, 2H)
    }


# ----------------------------------------------------------------------------
# Fused kernel: Q/K|V projections + multi-head attention + head merge
# ----------------------------------------------------------------------------
def _cross_attention_kernel(*refs, has_mask, num_heads):
    if has_mask:
        h_ref, c_ref, m_ref, wq_ref, bq_ref, wkv_ref, bkv_ref, o_ref = refs
    else:
        h_ref, c_ref, wq_ref, bq_ref, wkv_ref, bkv_ref, o_ref = refs
        m_ref = None

    bb, tq, H = h_ref.shape
    lk, cdim = c_ref.shape[1], c_ref.shape[2]
    nh = num_heads
    hd = H // nh
    cdt = wq_ref.dtype            # MXU operand dtype (weights prepped once)

    # Fused projections: one matmul for Q, one for the fused K|V weight.
    # Leading-dim folds only; f32 accumulation + f32 bias adds.
    hs2d = h_ref[...].astype(cdt).reshape(bb * tq, H)
    ctx2d = c_ref[...].astype(cdt).reshape(bb * lk, cdim)
    q2d = jnp.dot(hs2d, wq_ref[...],
                  preferred_element_type=jnp.float32) + bq_ref[...]
    kv2d = jnp.dot(ctx2d, wkv_ref[...],
                   preferred_element_type=jnp.float32) + bkv_ref[...]

    for b in range(bb):                               # static unroll, bb small
        qb = q2d[b * tq:(b + 1) * tq, :].astype(cdt)       # (tq, H)
        kvb = kv2d[b * lk:(b + 1) * lk, :].astype(cdt)     # (lk, 2H)

        # Head split: static lane slices stacked along a new leading (head)
        # axis so both attention matmuls are single head-batched dots.
        q3 = jnp.stack([qb[:, h * hd:(h + 1) * hd] for h in range(nh)], axis=0)
        k3 = jnp.stack([kvb[:, h * hd:(h + 1) * hd] for h in range(nh)], axis=0)
        v3 = jnp.stack([kvb[:, H + h * hd:H + (h + 1) * hd]
                        for h in range(nh)], axis=0)        # (nh, lk, hd)

        # scores (nh, tq, lk); scale already folded into Wq/bq at prep time.
        s = jnp.einsum("hqd,hkd->hqk", q3, k3,
                       preferred_element_type=jnp.float32)
        if m_ref is not None:
            s = s + m_ref[b]           # (1|nh, 1|tq, lk) broadcast add in f32

        # numerically-stable softmax in f32; divide goes to the EUP slot.
        s = s - jnp.max(s, axis=-1, keepdims=True)
        p = jnp.exp(s)
        p = p * pl.reciprocal(jnp.sum(p, axis=-1, keepdims=True), approx=True)
        # TODO(synk): attention_probs dropout (nn.Dropout) is identity in eval mode.

        o = jnp.einsum("hqk,hkd->hqd", p.astype(cdt), v3,
                       preferred_element_type=jnp.float32)   # (nh, tq, hd)
        # merge heads and store one lane-dense (tq, H) row block per batch item
        o_ref[b] = jnp.concatenate([o[h] for h in range(nh)],
                                   axis=-1).astype(o_ref.dtype)


# ----------------------------------------------------------------------------
# Block-size / VMEM heuristics
# ----------------------------------------------------------------------------
def _step_vmem_bytes(bb, tq, lk, H, cdim, nh, in_bytes, w_bytes, out_bytes,
                     mask_heads, mask_rows):
    hd = H // nh
    weights = (H * H + cdim * 2 * H) * w_bytes + 3 * H * 4
    blocks = bb * (tq * H * in_bytes + lk * cdim * in_bytes + tq * H * out_bytes)
    blocks += bb * mask_heads * mask_rows * lk * 4
    interm = bb * (tq * H + lk * 2 * H) * 4                  # q2d / kv2d (f32)
    interm += 3 * nh * max(tq, lk) * hd * 4                  # q3 / k3 / v3
    interm += 2 * nh * tq * lk * 4 + nh * tq * hd * 4        # scores, probs, out
    return 2 * (weights + blocks) + interm                   # 2x: double-buffered DMA


def _choose_blocks(B, Lq, step_bytes_fn, budget_bytes):
    # Largest batch block that still leaves >= 2 grid steps (two v7x TCs) and
    # fits the VMEM budget; bigger blocks amortise the ~0.35us/step overhead.
    batch_block = 1
    for d in range(1, B + 1):
        if B % d != 0:
            continue
        if B >= 2 and B // d < 2:
            continue
        if step_bytes_fn(d, Lq) <= budget_bytes:
            batch_block = d
    q_block = Lq
    if B // batch_block < 2:                 # B == 1: split queries instead
        half = Lq // 2
        if (half >= 8 and half % 8 == 0 and Lq % half == 0
                and step_bytes_fn(batch_block, half) <= budget_bytes):
            q_block = half
    return batch_block, q_block


# ----------------------------------------------------------------------------
# Wrapper
# ----------------------------------------------------------------------------
def cross_attention_forward(hidden_states, context, attention_mask, prepped,
                            num_heads, *, batch_block=None, q_block=None,
                            vmem_limit_bytes=None):
    """CrossAttention.forward: (B, Lq, H), (B, Lk, Cd) -> (B, Lq, H)."""
    B, Lq, H = hidden_states.shape
    Bc, Lk, Cd = context.shape
    assert Bc == B and H % num_heads == 0

    wq, bq, wkv, bkv = prepped["wq"], prepped["bq"], prepped["wkv"], prepped["bkv"]
    assert wq.shape == (H, H) and wkv.shape == (Cd, 2 * H)

    # ---- mask canonicalisation (kept in broadcast form; f32 math) ----------
    has_mask = attention_mask is not None
    if has_mask:
        m = jnp.asarray(attention_mask, jnp.float32)
        if m.ndim == 2:                     # (Lq, Lk), reference semantics
            m = m[None, None]
        elif m.ndim == 3:                   # (B, Lq, Lk) or (B, 1, Lk)
            m = m[:, None]
        if m.ndim != 4:
            raise ValueError("attention_mask must have 2..4 dims")
        mb, mh, mq, mk = m.shape
        if mh not in (1, num_heads) or mq not in (1, Lq) or mk != Lk:
            raise ValueError("attention_mask is not broadcastable to scores")
        if mb == 1 and B > 1:               # broadcast batch axis only (cheap)
            m = jnp.broadcast_to(m, (B, mh, mq, Lk))
        elif mb not in (1, B):
            raise ValueError("attention_mask batch dim mismatch")
    else:
        mh = mq = 1

    in_bytes = jnp.dtype(hidden_states.dtype).itemsize
    w_bytes = jnp.dtype(wq.dtype).itemsize
    out_bytes = in_bytes

    def step_bytes(bb, tq):
        return _step_vmem_bytes(
            bb, tq, Lk, H, Cd, num_heads, in_bytes, w_bytes, out_bytes,
            mh if has_mask else 0,
            ((1 if mq == 1 else tq) if has_mask else 0))

    budget = 40 * 2 ** 20
    auto_bb, auto_tq = _choose_blocks(B, Lq, step_bytes, budget)
    if batch_block is None:
        batch_block = auto_bb
    if q_block is None:
        q_block = auto_tq
    assert B % batch_block == 0 and Lq % q_block == 0
    grid = (B // batch_block, Lq // q_block)

    if vmem_limit_bytes is None:
        vmem_limit_bytes = int(min(64 * 2 ** 20,
                                   max(32 * 2 ** 20,
                                       2 * step_bytes(batch_block, q_block))))

    # ---- specs --------------------------------------------------------------
    args = [hidden_states, context]
    in_specs = [
        pl.BlockSpec((batch_block, q_block, H), lambda i, j: (i, j, 0)),
        pl.BlockSpec((batch_block, Lk, Cd), lambda i, j: (i, 0, 0)),
    ]
    if has_mask:
        mq_block = 1 if mq == 1 else q_block
        if mq == 1:
            mask_map = lambda i, j: (i, 0, 0, 0)
        else:
            mask_map = lambda i, j: (i, 0, j, 0)
        args.append(m)
        in_specs.append(
            pl.BlockSpec((batch_block, mh, mq_block, Lk), mask_map))

    # Constant-index weight blocks (no re-fetch across grid steps).
    args += [wq, bq, wkv, bkv]
    in_specs += [
        pl.BlockSpec((H, H), lambda i, j: (0, 0)),
        pl.BlockSpec((1, H), lambda i, j: (0, 0)),
        pl.BlockSpec((Cd, 2 * H), lambda i, j: (0, 0)),
        pl.BlockSpec((1, 2 * H), lambda i, j: (0, 0)),
    ]

    kernel = functools.partial(_cross_attention_kernel, has_mask=has_mask,
                               num_heads=num_heads)

    return pl.pallas_call(
        kernel,
        out_shape=jax.ShapeDtypeStruct((B, Lq, H), hidden_states.dtype),
        grid=grid,
        in_specs=in_specs,
        out_specs=pl.BlockSpec((batch_block, q_block, H),
                               lambda i, j: (i, j, 0)),
        compiler_params=pltpu.CompilerParams(
            dimension_semantics=("parallel", "parallel"),
            vmem_limit_bytes=vmem_limit_bytes),
    )(*args)


# ----------------------------------------------------------------------------
# Pure-JAX reference (mirrors the PyTorch module exactly, eval mode)
# ----------------------------------------------------------------------------
def reference_cross_attention(hidden_states, context, attention_mask, params,
                              num_heads):
    B, Lq, H = hidden_states.shape
    hd = H // num_heads
    wq, bq = params["q"]
    wk, bk = params["k"]
    wv, bv = params["v"]
    q = hidden_states @ wq + bq
    k = context @ wk + bk
    v = context @ wv + bv

    def heads(t):
        Bn, L, _ = t.shape
        return t.reshape(Bn, L, num_heads, hd).transpose(0, 2, 1, 3)

    q, k, v = heads(q), heads(k), heads(v)
    s = jnp.einsum("bhqd,bhkd->bhqk", q, k) / math.sqrt(hd)
    if attention_mask is not None:
        m = jnp.asarray(attention_mask, s.dtype)
        if m.ndim == 2:
            m = m[None]
        if m.ndim == 3:
            m = m[:, None]
        s = s + m
    p = jax.nn.softmax(s, axis=-1)
    o = jnp.einsum("bhqk,bhkd->bhqd", p, v)
    return o.transpose(0, 2, 1, 3).reshape(B, Lq, H)


# ----------------------------------------------------------------------------
# Demo / self-test
# ----------------------------------------------------------------------------
if __name__ == "__main__":
    B, Lq, Lk, H, NH = 2, 8, 16, 32, 4          # ctx_dim == hidden_size

    key = jax.random.PRNGKey(0)
    kh, kc, kq, kk, kv = jax.random.split(key, 5)

    def lin(k, din, dout):
        kw, kb = jax.random.split(k)
        w = jax.random.normal(kw, (din, dout), jnp.float32) * 0.05
        b = jax.random.normal(kb, (1, dout), jnp.float32) * 0.05
        return w, b

    params = {"q": lin(kq, H, H), "k": lin(kk, H, H), "v": lin(kv, H, H)}
    hidden_states = jax.random.normal(kh, (B, Lq, H), jnp.float32)
    context = jax.random.normal(kc, (B, Lk, H), jnp.float32)

    # BERT-style additive padding mask (B, 1, 1, Lk): mask the last 3 context
    # tokens of batch item 1 with a large negative (safer than -inf).
    keep = jnp.ones((B, Lk), jnp.float32).at[1, -3:].set(0.0)
    attention_mask = (1.0 - keep)[:, None, None, :] * -1e9

    # One-time parameter prep (scale folded into Wq/bq, K|V fused).  On
    # v6e/v7x pass compute_dtype=jnp.bfloat16 here for the bf16 MXU path.
    prepped = prepare_cross_attention_params(params, NH,
                                             compute_dtype=jnp.float32)

    fwd = jax.jit(functools.partial(cross_attention_forward, num_heads=NH))
    out = fwd(hidden_states, context, attention_mask, prepped)
    jax.block_until_ready(out)
    assert out.shape == (B, Lq, H)

    ref = reference_cross_attention(hidden_states, context, attention_mask,
                                    params, NH)
    np.testing.assert_allclose(np.asarray(out), np.asarray(ref),
                               atol=5e-3, rtol=5e-3)
    print("KERNEL_OK")
</pallas_src>

<mosaic_0001>
module attributes {stable_mosaic.version = 11 : i64} {
  func.func @_cross_attention_kernel(%arg0: i32, %arg1: i32, %arg2: memref<1x8x32xf32, #tpu.memory_space<vmem>>, %arg3: memref<1x16x32xf32, #tpu.memory_space<vmem>>, %arg4: memref<1x1x1x16xf32, #tpu.memory_space<vmem>>, %arg5: memref<32x32xf32, #tpu.memory_space<vmem>>, %arg6: memref<1x32xf32, #tpu.memory_space<vmem>>, %arg7: memref<32x64xf32, #tpu.memory_space<vmem>>, %arg8: memref<1x64xf32, #tpu.memory_space<vmem>>, %arg9: memref<1x8x32xf32, #tpu.memory_space<vmem>>) attributes {dimension_semantics = [#tpu.dimension_semantics<parallel>, #tpu.dimension_semantics<parallel>], iteration_bounds = array<i64: 2, 1>, scalar_prefetch = 0 : i64, scratch_operands = 0 : i64, tpu.core_type = #tpu.core_type<tc>, window_params = [{transform_indices = @transform_0, window_bounds = array<i64: 1, 8, 32>}, {transform_indices = @transform_1, window_bounds = array<i64: 1, 16, 32>}, {transform_indices = @transform_2, window_bounds = array<i64: 1, 1, 1, 16>}, {pipeline_mode = #tpu.pipeline_mode<synchronous>, transform_indices = @transform_3, window_bounds = array<i64: 32, 32>}, {pipeline_mode = #tpu.pipeline_mode<synchronous>, transform_indices = @transform_4, window_bounds = array<i64: 1, 32>}, {pipeline_mode = #tpu.pipeline_mode<synchronous>, transform_indices = @transform_5, window_bounds = array<i64: 32, 64>}, {pipeline_mode = #tpu.pipeline_mode<synchronous>, transform_indices = @transform_6, window_bounds = array<i64: 1, 64>}, {transform_indices = @transform_7, window_bounds = array<i64: 1, 8, 32>}]} {
    %c0 = arith.constant 0 : index
    %c0_0 = arith.constant 0 : index
    %c0_1 = arith.constant 0 : index
    %0 = vector.load %arg2[%c0, %c0_0, %c0_1] : memref<1x8x32xf32, #tpu.memory_space<vmem>>, vector<1x8x32xf32>
    %1 = vector.shape_cast %0 : vector<1x8x32xf32> to vector<8x32xf32>
    %c0_2 = arith.constant 0 : index
    %c0_3 = arith.constant 0 : index
    %c0_4 = arith.constant 0 : index
    %2 = vector.load %arg3[%c0_2, %c0_3, %c0_4] : memref<1x16x32xf32, #tpu.memory_space<vmem>>, vector<1x16x32xf32>
    %3 = vector.shape_cast %2 : vector<1x16x32xf32> to vector<16x32xf32>
    %c0_5 = arith.constant 0 : index
    %c0_6 = arith.constant 0 : index
    %4 = vector.load %arg5[%c0_5, %c0_6] : memref<32x32xf32, #tpu.memory_space<vmem>>, vector<32x32xf32>
    %cst = arith.constant dense<0.000000e+00> : vector<8x32xf32>
    %5 = tpu.matmul %1, %4, %cst {dimension_numbers = #tpu.dot_dimension_numbers<[1], [0], [0], [1], [0, 0, 1, 1], [], []>} : vector<8x32xf32>, vector<32x32xf32>, vector<8x32xf32> -> vector<8x32xf32>
    %c0_7 = arith.constant 0 : index
    %c0_8 = arith.constant 0 : index
    %6 = vector.load %arg6[%c0_7, %c0_8] : memref<1x32xf32, #tpu.memory_space<vmem>>, vector<1x32xf32>
    %7 = vector.broadcast %6 : vector<1x32xf32> to vector<8x32xf32>
    %8 = arith.addf %5, %7 : vector<8x32xf32>
    %c0_9 = arith.constant 0 : index
    %c0_10 = arith.constant 0 : index
    %9 = vector.load %arg7[%c0_9, %c0_10] : memref<32x64xf32, #tpu.memory_space<vmem>>, vector<32x64xf32>
    %cst_11 = arith.constant dense<0.000000e+00> : vector<16x64xf32>
    %10 = tpu.matmul %3, %9, %cst_11 {dimension_numbers = #tpu.dot_dimension_numbers<[1], [0], [0], [1], [0, 0, 1, 1], [], []>} : vector<16x32xf32>, vector<32x64xf32>, vector<16x64xf32> -> vector<16x64xf32>
    %c0_12 = arith.constant 0 : index
    %c0_13 = arith.constant 0 : index
    %11 = vector.load %arg8[%c0_12, %c0_13] : memref<1x64xf32, #tpu.memory_space<vmem>>, vector<1x64xf32>
    %12 = vector.broadcast %11 : vector<1x64xf32> to vector<16x64xf32>
    %13 = arith.addf %10, %12 : vector<16x64xf32>
    %14 = vector.extract_strided_slice %8 {offsets = [0, 0], sizes = [8, 8], strides = [1, 1]} : vector<8x32xf32> to vector<8x8xf32>
    %15 = vector.extract_strided_slice %8 {offsets = [0, 8], sizes = [8, 8], strides = [1, 1]} : vector<8x32xf32> to vector<8x8xf32>
    %16 = vector.extract_strided_slice %8 {offsets = [0, 16], sizes = [8, 8], strides = [1, 1]} : vector<8x32xf32> to vector<8x8xf32>
    %17 = vector.extract_strided_slice %8 {offsets = [0, 24], sizes = [8, 8], strides = [1, 1]} : vector<8x32xf32> to vector<8x8xf32>
    %18 = vector.shape_cast %14 : vector<8x8xf32> to vector<1x8x8xf32>
    %19 = vector.shape_cast %15 : vector<8x8xf32> to vector<1x8x8xf32>
    %20 = vector.shape_cast %16 : vector<8x8xf32> to vector<1x8x8xf32>
    %21 = vector.shape_cast %17 : vector<8x8xf32> to vector<1x8x8xf32>
    %22 = tpu.concatenate %18, %19, %20, %21 in 0 : vector<1x8x8xf32>, vector<1x8x8xf32>, vector<1x8x8xf32>, vector<1x8x8xf32> -> vector<4x8x8xf32>
    %23 = vector.extract_strided_slice %13 {offsets = [0, 0], sizes = [16, 8], strides = [1, 1]} : vector<16x64xf32> to vector<16x8xf32>
    %24 = vector.extract_strided_slice %13 {offsets = [0, 8], sizes = [16, 8], strides = [1, 1]} : vector<16x64xf32> to vector<16x8xf32>
    %25 = vector.extract_strided_slice %13 {offsets = [0, 16], sizes = [16, 8], strides = [1, 1]} : vector<16x64xf32> to vector<16x8xf32>
    %26 = vector.extract_strided_slice %13 {offsets = [0, 24], sizes = [16, 8], strides = [1, 1]} : vector<16x64xf32> to vector<16x8xf32>
    %27 = vector.shape_cast %23 : vector<16x8xf32> to vector<1x16x8xf32>
    %28 = vector.shape_cast %24 : vector<16x8xf32> to vector<1x16x8xf32>
    %29 = vector.shape_cast %25 : vector<16x8xf32> to vector<1x16x8xf32>
    %30 = vector.shape_cast %26 : vector<16x8xf32> to vector<1x16x8xf32>
    %31 = tpu.concatenate %27, %28, %29, %30 in 0 : vector<1x16x8xf32>, vector<1x16x8xf32>, vector<1x16x8xf32>, vector<1x16x8xf32> -> vector<4x16x8xf32>
    %32 = vector.extract_strided_slice %13 {offsets = [0, 32], sizes = [16, 8], strides = [1, 1]} : vector<16x64xf32> to vector<16x8xf32>
    %33 = vector.extract_strided_slice %13 {offsets = [0, 40], sizes = [16, 8], strides = [1, 1]} : vector<16x64xf32> to vector<16x8xf32>
    %34 = vector.extract_strided_slice %13 {offsets = [0, 48], sizes = [16, 8], strides = [1, 1]} : vector<16x64xf32> to vector<16x8xf32>
    %35 = vector.extract_strided_slice %13 {offsets = [0, 56], sizes = [16, 8], strides = [1, 1]} : vector<16x64xf32> to vector<16x8xf32>
    %36 = vector.shape_cast %32 : vector<16x8xf32> to vector<1x16x8xf32>
    %37 = vector.shape_cast %33 : vector<16x8xf32> to vector<1x16x8xf32>
    %38 = vector.shape_cast %34 : vector<16x8xf32> to vector<1x16x8xf32>
    %39 = vector.shape_cast %35 : vector<16x8xf32> to vector<1x16x8xf32>
    %40 = tpu.concatenate %36, %37, %38, %39 in 0 : vector<1x16x8xf32>, vector<1x16x8xf32>, vector<1x16x8xf32>, vector<1x16x8xf32> -> vector<4x16x8xf32>
    "tpu.trace_start"() <{level = 10 : i32, message = "hqd,hkd->hqk"}> : () -> ()
    %cst_14 = arith.constant dense<0.000000e+00> : vector<4x8x16xf32>
    %41 = tpu.matmul %22, %31, %cst_14 {dimension_numbers = #tpu.dot_dimension_numbers<[2], [2], [1], [1], [0, 0, 0, 1, 1, 1], [0], [0]>} : vector<4x8x8xf32>, vector<4x16x8xf32>, vector<4x8x16xf32> -> vector<4x8x16xf32>
    "tpu.trace_stop"() : () -> ()
    %c0_15 = arith.constant 0 : index
    %c0_16 = arith.constant 0 : index
    %c0_17 = arith.constant 0 : index
    %c0_18 = arith.constant 0 : index
    %42 = vector.load %arg4[%c0_15, %c0_16, %c0_17, %c0_18] : memref<1x1x1x16xf32, #tpu.memory_space<vmem>>, vector<1x1x1x16xf32>
    %43 = vector.shape_cast %42 : vector<1x1x1x16xf32> to vector<1x1x16xf32>
    %44 = vector.broadcast %43 : vector<1x1x16xf32> to vector<4x8x16xf32>
    %45 = arith.addf %41, %44 : vector<4x8x16xf32>
    %cst_19 = arith.constant dense<0xFF800000> : vector<4x8xf32>
    %46 = vector.multi_reduction <maximumf>, %45, %cst_19 [2] : vector<4x8x16xf32> to vector<4x8xf32>
    %47 = vector.shape_cast %46 : vector<4x8xf32> to vector<4x8x1xf32>
    %48 = vector.broadcast %47 : vector<4x8x1xf32> to vector<4x8x16xf32>
    %49 = arith.subf %45, %48 : vector<4x8x16xf32>
    %50 = math.exp %49 : vector<4x8x16xf32>
    %cst_20 = arith.constant dense<0.000000e+00> : vector<4x8xf32>
    %51 = vector.multi_reduction <add>, %50, %cst_20 [2] : vector<4x8x16xf32> to vector<4x8xf32>
    %52 = vector.shape_cast %51 : vector<4x8xf32> to vector<4x8x1xf32>
    %53 = tpu.reciprocal %52 {approx = true} : vector<4x8x1xf32> -> vector<4x8x1xf32>
    %54 = vector.broadcast %53 : vector<4x8x1xf32> to vector<4x8x16xf32>
    %55 = arith.mulf %50, %54 : vector<4x8x16xf32>
    "tpu.trace_start"() <{level = 10 : i32, message = "hqk,hkd->hqd"}> : () -> ()
    %cst_21 = arith.constant dense<0.000000e+00> : vector<4x8x8xf32>
    %56 = tpu.matmul %55, %40, %cst_21 {dimension_numbers = #tpu.dot_dimension_numbers<[2], [1], [1], [2], [0, 0, 0, 1, 1, 2], [0], [0]>} : vector<4x8x16xf32>, vector<4x16x8xf32>, vector<4x8x8xf32> -> vector<4x8x8xf32>
    "tpu.trace_stop"() : () -> ()
    %57 = vector.extract_strided_slice %56 {offsets = [0, 0, 0], sizes = [1, 8, 8], strides = [1, 1, 1]} : vector<4x8x8xf32> to vector<1x8x8xf32>
    %58 = vector.shape_cast %57 : vector<1x8x8xf32> to vector<8x8xf32>
    %59 = vector.extract_strided_slice %56 {offsets = [1, 0, 0], sizes = [1, 8, 8], strides = [1, 1, 1]} : vector<4x8x8xf32> to vector<1x8x8xf32>
    %60 = vector.shape_cast %59 : vector<1x8x8xf32> to vector<8x8xf32>
    %61 = vector.extract_strided_slice %56 {offsets = [2, 0, 0], sizes = [1, 8, 8], strides = [1, 1, 1]} : vector<4x8x8xf32> to vector<1x8x8xf32>
    %62 = vector.shape_cast %61 : vector<1x8x8xf32> to vector<8x8xf32>
    %63 = vector.extract_strided_slice %56 {offsets = [3, 0, 0], sizes = [1, 8, 8], strides = [1, 1, 1]} : vector<4x8x8xf32> to vector<1x8x8xf32>
    %64 = vector.shape_cast %63 : vector<1x8x8xf32> to vector<8x8xf32>
    %65 = tpu.concatenate %58, %60, %62, %64 in 1 : vector<8x8xf32>, vector<8x8xf32>, vector<8x8xf32>, vector<8x8xf32> -> vector<8x32xf32>
    %c0_22 = arith.constant 0 : index
    %c0_23 = arith.constant 0 : index
    %c0_24 = arith.constant 0 : index
    %66 = vector.load %arg9[%c0_22, %c0_23, %c0_24] : memref<1x8x32xf32, #tpu.memory_space<vmem>>, vector<1x8x32xf32>
    %67 = vector.shape_cast %66 : vector<1x8x32xf32> to vector<8x32xf32>
    %68 = vector.shape_cast %65 : vector<8x32xf32> to vector<1x8x32xf32>
    tpu.vector_store %arg9[%c0_22, %c0_23, %c0_24], %68 {strides = array<i32>} : memref<1x8x32xf32, #tpu.memory_space<vmem>>, vector<1x8x32xf32>,
    return
  }
  func.func @transform_0(%arg0: i32, %arg1: i32) -> (i32, i32, i32) {
    %c0_i32 = arith.constant 0 : i32
    %c0_i32_0 = arith.constant 0 : i32
    return %arg0, %arg1, %c0_i32 : i32, i32, i32
  }
  func.func @transform_1(%arg0: i32, %arg1: i32) -> (i32, i32, i32) {
    %c0_i32 = arith.constant 0 : i32
    %c0_i32_0 = arith.constant 0 : i32
    %c0_i32_1 = arith.constant 0 : i32
    return %arg0, %c0_i32, %c0_i32_0 : i32, i32, i32
  }
  func.func @transform_2(%arg0: i32, %arg1: i32) -> (i32, i32, i32, i32) {
    %c0_i32 = arith.constant 0 : i32
    %c0_i32_0 = arith.constant 0 : i32
    %c0_i32_1 = arith.constant 0 : i32
    %c0_i32_2 = arith.constant 0 : i32
    return %arg0, %c0_i32, %c0_i32_0, %c0_i32_1 : i32, i32, i32, i32
  }
  func.func @transform_3(%arg0: i32, %arg1: i32) -> (i32, i32) {
    %c0_i32 = arith.constant 0 : i32
    %c0_i32_0 = arith.constant 0 : i32
    %c0_i32_1 = arith.constant 0 : i32
    return %c0_i32, %c0_i32_0 : i32, i32
  }
  func.func @transform_4(%arg0: i32, %arg1: i32) -> (i32, i32) {
    %c0_i32 = arith.constant 0 : i32
    %c0_i32_0 = arith.constant 0 : i32
    %c0_i32_1 = arith.constant 0 : i32
    return %c0_i32, %c0_i32_0 : i32, i32
  }
  func.func @transform_5(%arg0: i32, %arg1: i32) -> (i32, i32) {
    %c0_i32 = arith.constant 0 : i32
    %c0_i32_0 = arith.constant 0 : i32
    %c0_i32_1 = arith.constant 0 : i32
    return %c0_i32, %c0_i32_0 : i32, i32
  }
  func.func @transform_6(%arg0: i32, %arg1: i32) -> (i32, i32) {
    %c0_i32 = arith.constant 0 : i32
    %c0_i32_0 = arith.constant 0 : i32
    %c0_i32_1 = arith.constant 0 : i32
    return %c0_i32, %c0_i32_0 : i32, i32
  }
  func.func @transform_7(%arg0: i32, %arg1: i32) -> (i32, i32, i32) {
    %c0_i32 = arith.constant 0 : i32
    %c0_i32_0 = arith.constant 0 : i32
    return %arg0, %arg1, %c0_i32 : i32, i32, i32
  }
}

</mosaic_0001>

<bundles_post_ra>
// kernel: cross_attention_forward.1
= control target key start
LH: loop header
LB: loop body
LE: loop exit
PB: predicated region body
PF: predicated region fallthrough
CT: control target
= control target key end

     0   :  { %s2468_s0 = inlined_call_operand.hbm [shape: f32[2,8,32], index: 0, kind: input, shape index: {}]   ;;  %s2469_s1 = inlined_call_operand.hbm [shape: f32[2,16,32], index: 1, kind: input, shape index: {}]   ;;  %s2470_s2 = inlined_call_operand.vmem [shape: f32[2,1,1,16], index: 2, kind: input, shape index: {}]   ;;  %s2471_s3 = inlined_call_operand.hbm [shape: f32[32,32], index: 3, kind: input, shape index: {}]   ;;  %s2472_s4 = inlined_call_operand.vmem [shape: f32[1,32], index: 4, kind: input, shape index: {}]   ;;  %s2473_s5 = inlined_call_operand.hbm [shape: f32[32,64], index: 5, kind: input, shape index: {}]   ;;  %s2474_s6 = inlined_call_operand.vmem [shape: f32[1,64], index: 6, kind: input, shape index: {}]   ;;  %s2475_s7 = inlined_call_operand.hbm [shape: f32[2,8,32], index: 7, kind: output, shape index: {}]  }
   0x1   :  { %2483 = sst [smem:[#allocation18_spill]] %s2468_s0 }
   0x2   :  { %2484 = sst [smem:[#allocation19_spill]] %s2471_s3 }
   0x3   :  { %2485 = sst [smem:[#allocation20_spill]] %s2473_s5 }
   0x4   :  { %12 = vsyncpa [#allocation3], 0 }
   0x5   :  { %14 = vsyncpa [#allocation3 + $0x1], 0 }
   0x6   :  { %15 = vsyncpa [#allocation6], 0 }
   0x7   :  { %17 = vsyncpa [#allocation6 + $0x1], 0 }
   0x8   :  { %18 = vsyncpa [#allocation9], 0 }
   0x9   :  { %19 = vsyncpa [#allocation4], 0 }
   0xa   :  { %21 = vsyncpa [#allocation4 + $0x1], 0  ;;  %s2050_s24 = smov 0   ;;  %s2052_s25 = smov 0  }
   0xb   :  { %s2054_s26 = smov 0   ;;  %s2056_s27 = smov 0  }
   0xc   :  { %s2058_s28 = smov 0   ;;  %s2060_s29 = smov 0  }
   0xd LB: > { %s2081_s30 = sadd.s32 4294967295, %s1991_s29   ;;  %s1432_s8 = sadd.s32 4294967294, %s1991_s29   ;;  %s1991_s29 = sphi %s2060_s29, %s27_s29   ;;  %s1987_s28 = sphi %s2058_s28, %s2517_s28   ;;  %s1983_s27 = sphi %s2056_s27, %s2516_s27   ;;  %s1979_s26 = sphi %s2054_s26, %s2515_s26   ;;  %s1975_s25 = sphi %s2052_s25, %s2514_s25   ;;  %s1971_s24 = sphi %s2050_s24, %s2513_s24  }
   0xe   : > { %p61_p0 = scmp.ne.s32.totalorder %s1975_s25, %s1971_s24  ;;  %p2476_p1 = scmp.eq.s32.totalorder %s2081_s30, 0 }
   0xf   : > { %p229_p3 = scmp.eq.s32.totalorder %s1432_s8, 1  ;;  %p1433_p5 = scmp.ge.s32.totalorder %s1991_s29, 1 }
  0x10   : > { %p2090_p4 = por %p2476_p1, %p61_p0  ;;  %p236_p7 = scmp.lt.s32.totalorder %s1991_s29, 3 }
  0x11   : > { %p2095_p6 = por %p229_p3, %p61_p0  ;;  %s1993_s12 = smov [#allocation7]  }
  0x12   : > { %s2486_s9 = scalar_select %p2090_p4, 1, 0 }
  0x13   : > { %s2487_s10 = scalar_select %p2095_p6, 1, 0 }
  0x14   : > { %p2100_p8 = pnand %p1433_p5, %p236_p7  ;;  %s248_s13 = sshll.u32 %s1993_s12, 4  ;;  %s2104_s13 = int_to_ptr.vmem [resolvable:$true] %s248_s13 }
  0x15   : > { %2488 = sst [smem:[#allocation16_spill]] %s2487_s10  ;;  %s1994_s15 = smov [#allocation8]  }
  0x16   : > { %p1644_p9 = pneg %p2100_p8  ;;  %s264_s16 = sshll.u32 %s1994_s15, 4  ;;  %s2115_s16 = int_to_ptr.vmem [resolvable:$true] %s264_s16 }
  0x17   : > { %s2491_s3 = sld [smem:[#allocation19_spill]] }
  0x18   : > { %p2111_p11 = pnand %p1644_p9, %p2476_p1 }
  0x1a   : > { %p1783_p13 = pneg %p2111_p11 }
  0x1d   : > { %s1781_s19 = scalar_lea.hbm %s2491_s3, 512 }
  0x1e   : > { %p1782_p12 = scmp.ne.s32.totalorder %s2491_s3, %s1781_s19  ;;  %p1788_p5 = scmp.lt.u32.totalorder %s1781_s19, %s2491_s3 }
  0x20   : > { %p1784_p0 = pnand %p1783_p13, %p1782_p12 }
  0x22   : > { %p1785_p3 = pneg %p1784_p0 }
  0x24   : > { %p1790_p7 = pnand %p1788_p5, %p1785_p3 }
  0x26   : > { %1793 = shalt.err (!%p1790_p7)
}
  0x27   : > { %s1794_s8 = scalar_lea.vmem %s2104_s13, 512  ;;  %p1802_p2 = scmp.lt.s32.totalorder %s2104_s13, %s2104_s13 }
  0x28   : > { %p1795_p9 = scmp.ne.s32.totalorder %s2104_s13, %s1794_s8  ;;  %p1803_p12 = scmp.lt.s32.totalorder %s1794_s8, %s1794_s8 }
  0x2a   : > { %p1797_p10 = pnand %p1795_p9, %p1783_p13  ;;  %p1804_p0 = por %p1803_p12, %p1802_p2 }
  0x2c   : > { %p1798_p1 = pneg %p1797_p10 }
  0x2e   : > { %p1805_p6 = pnand %p1804_p0, %p1798_p1 }
  0x30   : > { %1808 = shalt.err (!%p1805_p6)
}
  0x31   : > { %s2478_s12 = smov 128   ;;  %s2479_s15 = smov 8  }
  0x32   : > { %1647 = dma.hbm_to_vmem [thread:$0]  (!%p2111_p11), %s2491_s3, 512, %s2104_s13, [#allocation6], %s2478_s12, %s2478_s12, %s2479_s15  }
  0x33   : > { %s2492_s5 = sld [smem:[#allocation20_spill]] }
  0x39   : > { %s1809_s21 = scalar_lea.hbm %s2492_s5, 512 }
  0x3a   : > { %p1810_p1 = scmp.ne.s32.totalorder %s2492_s5, %s1809_s21  ;;  %p1816_p10 = scmp.lt.u32.totalorder %s1809_s21, %s2492_s5 }
  0x3c   : > { %p1812_p2 = pnand %p1810_p1, %p1783_p13 }
  0x3e   : > { %p1813_p6 = pneg %p1812_p2 }
  0x40   : > { %p1818_p3 = pnand %p1816_p10, %p1813_p6 }
  0x42   : > { %1821 = shalt.err (!%p1818_p3)
}
  0x43   : > { %s1822_s13 = scalar_lea.vmem %s2115_s16, 512  ;;  %p1830_p12 = scmp.lt.s32.totalorder %s2115_s16, %s2115_s16 }
  0x44   : > { %p1823_p5 = scmp.ne.s32.totalorder %s2115_s16, %s1822_s13  ;;  %p1831_p0 = scmp.lt.s32.totalorder %s1822_s13, %s1822_s13 }
  0x46   : > { %p1825_p7 = pnand %p1823_p5, %p1783_p13  ;;  %p1832_p1 = por %p1831_p0, %p1830_p12 }
  0x48   : > { %p1826_p9 = pneg %p1825_p7 }
  0x4a   : > { %p1833_p2 = pnand %p1832_p1, %p1826_p9 }
  0x4c   : > { %1836 = shalt.err (!%p1833_p2)
}
  0x4d   : > { %1650 = dma.hbm_to_vmem [thread:$0]  (!%p2111_p11), %s2492_s5, 512, %s2115_s16, [#allocation9], %s2478_s12, %s2478_s12, %s2479_s15  }
  0x4e   : > { %s39_s14 = sadd.s32 1, %s1987_s28  ;;  %s48_s18 = sadd.s32 1, %s1979_s26 }
  0x4f   : > { %p41_p13 = scmp.ge.s32.totalorder %s39_s14, 2  ;;  %p55_p6 = scmp.ne.s32.totalorder %s1979_s26, %s1975_s25 }
  0x50   : > { %p56_p10 = scmp.eq.s32.totalorder %s1991_s29, 0  ;;  %p1664_p3 = scmp.lt.s32.totalorder %s1991_s29, 2 }
  0x51   : > { %s2519_s14 = smov (%p41_p13, %s39_s14), 0  ;;  %p2494_p7 = scmp.eq.s32.totalorder %s2081_s30, 1 }
  0x52   : > { %2493 = sst [smem:[#allocation17_spill]] %s2519_s14  ;;  %p57_p5 = por %p56_p10, %p55_p6 }
  0x53   : > { %p2185_p9 = por %p2494_p7, %p55_p6  ;;  %s43_s20 = ssub.s32 %s1987_s28, %s2519_s14 }
  0x54   : > { %s2192_s21 = sand.u32 1, %s1979_s26   ;;  %p46_p11 = scmp.eq.s32.totalorder %s43_s20, 0 }
  0x55   : > { %s2495_s19 = scalar_select %p2185_p9, 1, 0 }
  0x56   : > { %s1437_s16 = sshll.u32 %s2192_s21, 3  ;;  %s1438_s22 = sshll.u32 %s1987_s28, 7 }
  0x57   : > { %s2197_s23 = scalar_select %p46_p11, %s1979_s26, %s48_s18  }
  0x58   : > { %s2496_s0 = sld [smem:[#allocation18_spill]]  ;;  %s285_s17 = scalar_lea.vmem [#allocation2], %s1437_s16 }
  0x59   : > { %s293_s12 = sshll.u32 %s285_s17, 4  ;;  %p2206_p12 = pnand %p1664_p3, %p57_p5  ;;  %s2210_s12 = int_to_ptr.vmem [resolvable:$true] %s293_s12 }
  0x5a   : > { %s282_s20 = scalar_lea.sflag [#allocation3], %s2192_s21 }
  0x5b   : > { %p1839_p1 = pneg %p2206_p12 }
  0x5e   : > { %s2202_s10 = scalar_lea.hbm %s2496_s0, %s1438_s22  ;;  %s1842_s13 = scalar_lea.hbm %s2496_s0, 256 }
  0x5f   : > { %s1837_s8 = scalar_lea.hbm %s2202_s10, 128  ;;  %p1843_p6 = scmp.lt.u32.totalorder %s2202_s10, %s2496_s0 }
  0x60   : > { %p1838_p0 = scmp.ne.s32.totalorder %s2202_s10, %s1837_s8  ;;  %p1844_p10 = scmp.lt.u32.totalorder %s1842_s13, %s1837_s8 }
  0x61   : > { %p1846_p5 = scmp.lt.u32.totalorder %s1837_s8, %s2202_s10 }
  0x62   : > { %p1840_p2 = pnand %p1839_p1, %p1838_p0  ;;  %p1845_p3 = por %p1844_p10, %p1843_p6 }
  0x64   : > { %p1841_p13 = pneg %p1840_p2  ;;  %p1847_p7 = por %p1846_p5, %p1845_p3 }
  0x66   : > { %p1848_p11 = pnand %p1847_p7, %p1841_p13 }
  0x68   : > { %1851 = shalt.err (!%p1848_p11)
}
  0x69   : > { %s1852_s18 = scalar_lea.vmem %s2210_s12, 128  ;;  %s1997_s16 = smov [#allocation2]  }
  0x6a   : > { %p1853_p0 = scmp.ne.s32.totalorder %s2210_s12, %s1852_s18  ;;  %s1857_s22 = sshll.u32 %s1997_s16, 4  ;;  %s1858_s22 = int_to_ptr.vmem [resolvable:$false] %s1857_s22 }
  0x6b   : > { %s1859_s3 = scalar_lea.vmem %s1858_s22, 256  ;;  %p1860_p4 = scmp.lt.s32.totalorder %s2210_s12, %s1858_s22 }
  0x6c   : > { %p1855_p2 = pnand %p1853_p0, %p1839_p1  ;;  %p1861_p6 = scmp.lt.s32.totalorder %s1859_s3, %s1852_s18 }
  0x6e   : > { %p1856_p9 = pneg %p1855_p2  ;;  %p1862_p10 = por %p1861_p6, %p1860_p4 }
  0x70   : > { %p1863_p3 = pnand %p1862_p10, %p1856_p9 }
  0x72   : > { %1866 = shalt.err (!%p1863_p3)
}
  0x73   : > { %1654 = dma.hbm_to_vmem [thread:$0]  (!%p2206_p12), %s2202_s10, 128, %s2210_s12, %s282_s20  }
  0x74   : > { %s1474_s8 = sshll.u32 %s1987_s28, 8  ;;  %s2498_s13 = sshll.u32 %s2192_s21, 4 }
  0x75   : > { %s304_s17 = scalar_lea.vmem [#allocation5], %s2498_s13  ;;  %s300_s22 = sand.u32 1, %s1991_s29  }
  0x76   : > { %s311_s16 = sshll.u32 %s304_s17, 4  ;;  %s2248_s0 = scalar_lea.hbm %s2469_s1, %s1474_s8  ;;  %s2242_s16 = int_to_ptr.vmem [resolvable:$true] %s311_s16 }
  0x77   : > { %s2250_s5 = scalar_lea.sflag [#allocation6], %s300_s22  ;;  %s1867_s14 = scalar_lea.hbm %s2248_s0, 256 }
  0x78   : > { %p1868_p4 = scmp.ne.s32.totalorder %s2248_s0, %s1867_s14  ;;  %s1872_s10 = scalar_lea.hbm %s2469_s1, 512 }
  0x79   : > { %p1873_p5 = scmp.lt.u32.totalorder %s2248_s0, %s2469_s1  ;;  %p1874_p7 = scmp.lt.u32.totalorder %s1872_s10, %s1867_s14 }
  0x7a   : > { %p1870_p9 = pnand %p1868_p4, %p1839_p1  ;;  %p1876_p0 = scmp.lt.u32.totalorder %s1867_s14, %s2248_s0 }
  0x7b   : > { %p1875_p11 = por %p1874_p7, %p1873_p5 }
  0x7c   : > { %p1871_p13 = pneg %p1870_p9 }
  0x7d   : > { %p1877_p2 = por %p1876_p0, %p1875_p11 }
  0x7f   : > { %p1878_p6 = pnand %p1877_p2, %p1871_p13 }
  0x81   : > { %1881 = shalt.err (!%p1878_p6)
}
  0x82   : > { %s1882_s8 = scalar_lea.vmem %s2242_s16, 256  ;;  %s1998_s17 = smov [#allocation5]  }
  0x83   : > { %p1883_p10 = scmp.ne.s32.totalorder %s2242_s16, %s1882_s8  ;;  %s1887_s22 = sshll.u32 %s1998_s17, 4  ;;  %s1888_s22 = int_to_ptr.vmem [resolvable:$false] %s1887_s22 }
  0x84   : > { %s1889_s18 = scalar_lea.vmem %s1888_s22, 512  ;;  %p1890_p9 = scmp.lt.s32.totalorder %s2242_s16, %s1888_s22 }
  0x85   : > { %p1885_p3 = pnand %p1883_p10, %p1839_p1  ;;  %p1891_p5 = scmp.lt.s32.totalorder %s1889_s18, %s1882_s8 }
  0x87   : > { %p1886_p4 = pneg %p1885_p3  ;;  %p1892_p7 = por %p1891_p5, %p1890_p9 }
  0x89   : > { %p1893_p11 = pnand %p1892_p7, %p1886_p4 }
  0x8b   : > { %1896 = shalt.err (!%p1893_p11)
}
  0x8c   : > { %s2499_s14 = smov 8   ;;  %s2500_s3 = smov 128  }
  0x8d   : > { %1657 = dma.hbm_to_vmem [thread:$0]  (!%p2206_p12), %s2248_s0, 256, %s2242_s16, %s2250_s5, %s2500_s3, %s2500_s3, %s2499_s14  }
  0x8e   : > { %329 = sbr.rel (%p2100_p8) target bundleno = 1393 (0x571), region = 48  ;;  %s2282_s12 = sand.u32 (!%p2100_p8), 1, %s1975_s25  }
  0x8f   : > { %s1443_s21 = sshll.u32 (!%p2100_p8), %s2282_s12, 3  ;;  %s332_s10 = scalar_lea.sflag (!%p2100_p8), [#allocation3], %s2282_s12 }
  0x90   : > { %s2288_s15 = scalar_lea.vmem (!%p2100_p8), [#allocation2], %s1443_s21  ;;  %p2501_p1 = scmp.ne.s32.totalorder (!%p2100_p8), %s2486_s9, 0 }
  0x95   : > { %1950 = dma.done.wait (%p2501_p1), %s332_s10, 128  }
  0x96   : > { %1952 = vsyncadd (%p2501_p1), %s332_s10, 4294967168  ;;  %s340_s0 = sand.u32 1, %s2081_s30   ;;  %s1444_s5 = sshll.u32 %s2282_s12, 4 }
  0x97   : > { %s341_s11 = scalar_lea.sflag [#allocation6], %s340_s0  ;;  %s2296_s16 = scalar_lea.vmem [#allocation5], %s1444_s5 }
  0x98   : > { %1954 = dma.done.wait (%p2501_p1), %s341_s11, 256  }
  0x99   : > { %1956 = vsyncadd (%p2501_p1), %s341_s11, 4294967040  ;;  %p2502_p8 = scmp.eq.s32.totalorder %s2081_s30, 0 }
  0x9b   : > { %1958 = dma.done.wait (%p2502_p8), [#allocation6], 512   ;;  %p2503_p12 = pmov %p2502_p8 }
  0x9c   : > { %p2504_p13 = pmov %p2502_p8 }
  0x9d   : > { %1960 = vsyncadd (%p2503_p12), [#allocation6], 4294966784 }
  0x9e   : > { %1962 = dma.done.wait (%p2504_p13), [#allocation9], 512   ;;  %p2505_p0 = pmov %p2502_p8 }
  0x9f   : > { %v1999_v0 = vmov 0.0|0.0   ;;  %vm2000_vm0 = vmmov 0   ;;  %v2001_v1 = vmov 0.0   ;;  %vm408_vm1 = vcmask 261120   ;;  %v482_v2 = vld [vmem:[#allocation8] sm:$0xff]  ;;  %v483_v3 = vld [vmem:[#allocation8 + $0x8] sm:$0xff] }
  0xa0   : > { %1964 = vsyncadd (%p2505_p0), [#allocation9], 4294966784  ;;  %1588 = vmatprep.subr.bf16.mxu0 %v1999_v0  ;;  %1518 = vmatprep.mubr.msk.f32.mxu0 %vm2000_vm0, %v2001_v1  ;;  %v484_v4 = vld [vmem:[#allocation8 + $0x10] sm:$0xff]  ;;  %v1594_v5 = vpack.c.bf16 %v483_v3, %v482_v2  ;;  %v485_v6 = vld [vmem:[#allocation8 + $0x18] sm:$0xff]  ;;  %vm602_vm2 = vcmask 64512   ;;  %s2002_s8 = smov 104  }
  0xa1   : > { %v395_v7 = vld [vmem:[%s2296_s16] sm:$0xff]  ;;  %v1598_v8 = vpack.c.bf16 %v485_v6, %v484_v4  ;;  %v398_v10 = vld [vmem:[#allocation7 + $0x8] sm:$0xff]  ;;  %v400_v13 = vld [vmem:[#allocation7 + $0x18] sm:$0xff]  ;;  %s2003_s17 = smov 120   ;;  %s2004_s22 = smov 112   ;;  %vm907_vm4 = vcmask 130048  }
  0xa2   : > { %1529 = vmatprep.mubr.msk.f32.mxu1 %vm408_vm1, %v395_v7  ;;  %v397_v9 = vld [vmem:[#allocation7] sm:$0xff]  ;;  %v399_v11 = vld [vmem:[#allocation7 + $0x10] sm:$0xff]  ;;  %1595 = vmatprep.subr.bf16.mxu1 %v1594_v5  ;;  %v396_v15 = vld [vmem:[%s2296_s16 + $0x8] sm:$0xff]  ;;  %p391_p2 = scmp.lt.s32.totalorder %s1983_s27, 1  ;;  %s2006_s0 = smov 16   ;;  %vm1282_vm5 = vcmask 195584  }
  0xa3   : > { %v1589_v12 = vpack.c.bf16 %v398_v10, %v397_v9  ;;  %1597 = vmatpush3.bf16.msra.mxu1 %v1594_v5  ;;  %v1592_v14 = vpack.c.bf16 %v400_v13, %v399_v11  ;;  %v394_v16 = vld [vmem:[%s2288_s15] sm:$0xff]  ;;  %vm2336_vm3 = vmpackc.low %vm602_vm2, %vm602_vm2  ;;  %s2005_s15 = smov 96   ;;  %s2007_s5 = smov 8  }
  0xa4   : > { %1599 = vmatprep.subr.bf16.mxu1 %v1598_v8  ;;  %v1450_v17 = vld [vmem:[%s2474_s6] ss:$0 sm:$0xff]  ;;  %s392_s18 = scalar_select %p391_p2, %s1983_s27, 1 }
  0xa5   : > { %1590 = vmatpush3.bf16.msra.mxu0 %v1589_v12  ;;  %v1448_v24 = vld [vmem:[%s2472_s4] ss:$0 sm:$0xff]  ;;  %s2008_s11 = smov 24   ;;  %s1471_s16 = sshll.u32 %s1983_s27, 7 }
  0xa6   : > { %1591 = vmatprep.subr.bf16.mxu0 %v1999_v0  ;;  %s393_s10 = scalar_lea.vmem %s2470_s2, %s392_s18  ;;  %s390_s30 = scalar_lea.vmem [#allocation10], %s1443_s21 }
  0xa7   : > { %1601 = vmatpush3.bf16.msra.mxu1 %v1598_v8  ;;  %v1453_v44 = vld [vmem:[%s393_s10] ss:$0 sm:$0xff]  ;;  %s1300_s9 = sshll.u32 %s390_s30, 4  ;;  %s1286_s27 = scalar_lea.sflag [#allocation4], %s2282_s12  ;;  %s2420_s9 = int_to_ptr.vmem [resolvable:$true] %s1300_s9 }
  0xa8   : > { %1606 = vmatprep.subr.bf16.mxu1 %v1999_v0  ;;  %s1897_s21 = scalar_lea.vmem %s2420_s9, 128  ;;  %p2508_p10 = scmp.ne.s32.totalorder %s2495_s19, 0 }
  0xa9   : > { %1593 = vmatpush3.bf16.msra.mxu0 %v1592_v14  ;;  %p1898_p6 = scmp.ne.s32.totalorder %s2420_s9, %s1897_s21 }
  0xaa   : > { %1602 = vmatprep.subr.bf16.mxu0 %v1999_v0  ;;  %1530 = vmatmul.mubr.msk.f32.vlgmr.msra.gmra.mrb[0].mxu1 %vm408_vm1, %v396_v15 }
  0xab   : > { %1543 = vmatprep.mubr.msk.f32.mxu1 %vm2000_vm0, %v2001_v1  ;;  %p1899_p3 = pnand %p1898_p6, %p2508_p10 }
  0xac   : > { %1519 = vmatmul.mubr.msk.f32.vlgmr.msra.gmra.mrb[0].mxu0 %vm408_vm1, %v394_v16 }
  0xad   : > { %1536 = vmatprep.mubr.msk.f32.mxu0 %vm2000_vm0, %v2001_v1  ;;  %p1900_p4 = pneg %p1899_p3 }
 0x17d   : > { %v1531_v18 = vpop.f32.mrb[0].mxu1 }
 0x17e   : > { %v571_v19 = vadd.f32 %v1531_v18, %v1450_v17  ;;  %v565_v20 = vpop.f32.mrb[1].mxu1 }
 0x17f   : > { %v478_v21 = vpop.f32.mrb[0].mxu0  ;;  %v566_v22 = vadd.f32 %v1450_v17, %v565_v20 }
 0x180   : > { %v1520_v23 = vpop.f32.mrb[1].mxu0  ;;  %v479_v28 = vadd.f32 %v1448_v24, %v478_v21 }
 0x181   : > { %v2332_v25 = vpack.i.bf16 %v571_v19, %v566_v22  ;;  %v1603_v26 = vpack.c.bf16 %v571_v19, %v566_v22 }
 0x183   : > { %1741 = vrot.lane.b32.xlu1 %v2332_v25, %s2002_s8  ;;  %1731 = vrot.lane.b32.xlu0 %v2332_v25, %s2003_s17 }
 0x184   : > { %1605 = vmatpush3.bf16.xpose.msk.msra.mxu0 %vm2336_vm3, %v1603_v26 }
 0x185   : > { %1610 = vmatprep.subr.bf16.mxu0 %v1999_v0 }
 0x187   : > { %1736 = vrot.lane.b32.xlu0 %v2332_v25, %s2004_s22  ;;  %575 = vrot.lane.b32.xlu1 %v479_v28, %s2003_s17  ;;  %s2009_s17 = smov [#allocation10]  }
 0x18b   : > { %1537 = vmatmul.mubr.msk.f32.vlgmr.msra.gmra.mrb[2].mxu0 %vm602_vm2, %v479_v28  ;;  %577 = vrot.lane.b32.xlu0 %v479_v28, %s2004_s22  ;;  %s1901_s22 = sshll.u32 %s2009_s17, 4  ;;  %s1902_s22 = int_to_ptr.vmem [resolvable:$false] %s1901_s22 }
 0x18c   : > { %579 = vrot.lane.b32.xlu1 %v479_v28, %s2002_s8  ;;  %1550 = vmatprep.mubr.msk.f32.mxu0 %vm2000_vm0, %v2001_v1  ;;  %s2418_s8 = scalar_lea.hbm %s2475_s7, %s1471_s16  ;;  %s1903_s18 = scalar_lea.vmem %s1902_s22, 256 }
 0x18d   : > { %p1904_p9 = scmp.lt.s32.totalorder %s2420_s9, %s1902_s22  ;;  %p1905_p5 = scmp.lt.s32.totalorder %s1903_s18, %s1897_s21 }
 0x18f   : > { %p1906_p7 = por %p1905_p5, %p1904_p9 }
 0x191   : > { %p1907_p11 = pnand %p1906_p7, %p1900_p4 }
 0x1f5   : > { %v2349_v29 = vpop.permute.xlu1 %1741  ;;  %v2351_v30 = vpop.permute.xlu0 %1731 }
 0x1f6   : > { %v1744_v31 = vunpack.i.h.bf16 %v2349_v29  ;;  %v1743_v32 = vunpack.i.l.bf16 %v2349_v29  ;;  %v1734_v33 = vunpack.i.h.bf16 %v2351_v30  ;;  %v1733_v34 = vunpack.i.l.bf16 %v2351_v30 }
 0x1f8   : > { %v1607_v35 = vpack.c.bf16 %v1734_v33, %v1733_v34  ;;  %v1615_v40 = vpack.c.bf16 %v1744_v31, %v1743_v32 }
 0x1f9   : > { %v2357_v36 = vpop.permute.xlu0 %1736  ;;  %v576_v41 = vpop.permute.xlu1 %575 }
 0x1fa   : > { %v1739_v37 = vunpack.i.h.bf16 %v2357_v36  ;;  %v1738_v38 = vunpack.i.l.bf16 %v2357_v36  ;;  %1609 = vmatpush3.bf16.xpose.msk.msra.mxu1 %vm2336_vm3, %v1607_v35 }
 0x1fb   : > { %1614 = vmatprep.subr.bf16.mxu1 %v1999_v0 }
 0x1fc   : > { %v1611_v39 = vpack.c.bf16 %v1739_v37, %v1738_v38 }
 0x1fd   : > { %v578_v42 = vpop.permute.xlu0 %577 }
 0x1fe   : > { %1613 = vmatpush3.bf16.xpose.msk.msra.mxu0 %vm2336_vm3, %v1611_v39  ;;  %v580_v43 = vpop.permute.xlu1 %579 }
 0x1ff   : > { %1618 = vmatprep.subr.bf16.mxu0 %v1999_v0 }
 0x201   : > { %1544 = vmatmul.mubr.msk.f32.vlgmr.msra.gmra.mrb[2].mxu1 %vm602_vm2, %v576_v41 }
 0x202   : > { %1617 = vmatpush3.bf16.xpose.msk.msra.mxu1 %vm2336_vm3, %v1615_v40  ;;  %1557 = vmatprep.mubr.msk.f32.mxu1 %vm2000_vm0, %v2001_v1 }
 0x203   : > { %1621 = vmatprep.subr.bf16.mxu1 %v1999_v0 }
 0x205   : > { %1551 = vmatmul.mubr.msk.f32.vlgmr.msra.gmra.mrb[4].mxu0 %vm602_vm2, %v578_v42 }
 0x206   : > { %1564 = vmatprep.mubr.msk.f32.mxu0 %vm2000_vm0, %v2001_v1 }
 0x209   : > { %1558 = vmatmul.mubr.msk.f32.vlgmr.msra.gmra.mrb[4].mxu1 %vm602_vm2, %v580_v43 }
 0x20a   : > { %1571 = vmatprep.mubr.msk.f32.mxu1 %vm2000_vm0, %v2001_v1 }
 0x25e   : > { %v675_v45 = vpop.f32.mrb[2].mxu0 }
 0x25f   : > { %v676_v46 = vadd.f32 %v1453_v44, %v675_v45  ;;  %v1538_v47 = vpop.f32.mrb[3].mxu0 }
 0x261   : > { %v908_v48 = vsel %vm907_vm4, %v676_v46, -inf }
 0x262   : > { %909 = vmax.xlane.f32.xlu0 %v908_v48 }
 0x2d4   : > { %v751_v49 = vpop.f32.mrb[2].mxu1 }
 0x2d5   : > { %v752_v50 = vadd.f32 %v1453_v44, %v751_v49  ;;  %v1545_v51 = vpop.f32.mrb[3].mxu1 }
 0x2d7   : > { %v911_v52 = vsel %vm907_vm4, %v752_v50, -inf }
 0x2d8   : > { %912 = vmax.xlane.f32.xlu1 %v911_v52  ;;  %v827_v53 = vpop.f32.mrb[4].mxu0 }
 0x2d9   : > { %v828_v54 = vadd.f32 %v1453_v44, %v827_v53  ;;  %v1552_v55 = vpop.f32.mrb[5].mxu0 }
 0x2db   : > { %v914_v56 = vsel %vm907_vm4, %v828_v54, -inf }
 0x2dc   : > { %v903_v57 = vpop.f32.mrb[4].mxu1  ;;  %915 = vmax.xlane.f32.xlu0 %v914_v56 }
 0x2dd   : > { %v904_v58 = vadd.f32 %v1453_v44, %v903_v57  ;;  %v1559_v59 = vpop.f32.mrb[5].mxu1 }
 0x2df   : > { %v917_v60 = vsel %vm907_vm4, %v904_v58, -inf }
 0x2e0   : > { %918 = vmax.xlane.f32.xlu0 %v917_v60 }
 0x2e9   : > { %1746 = vrot.lane.b32.xlu1 %v2332_v25, %s2005_s15 }
 0x2ef   : > { %v910_v61 = vpop.xlane.xlu0 %909 }
 0x2f0   : > { %v920_v62 = vsub.f32 %v676_v46, %v910_v61 }
 0x2f2   : > { %v924_v63 = vmul.f32 1.442695, %v920_v62 }
 0x2f4   : > { %1765 = vpow2.f32 %v924_v63 }
 0x2fe   : > { %v1766_v2 = vpop.eup %1765 }
 0x2ff   : > { %v932_v3 = vsel %vm907_vm4, %v1766_v2, 0.0 }
 0x30d   : > { %933 = vadd.xlane.f32.xlu1 %v932_v3 }
 0x365   : > { %v913_v4 = vpop.xlane.xlu1 %912 }
 0x366   : > { %v921_v5 = vsub.f32 %v752_v50, %v913_v4 }
 0x368   : > { %v926_v6 = vmul.f32 1.442695, %v921_v5 }
 0x369   : > { %v1747_v7 = vpop.permute.xlu1 %1746  ;;  %v916_v8 = vpop.xlane.xlu0 %915 }
 0x36a   : > { %1767 = vpow2.f32 %v926_v6  ;;  %v1749_v9 = vunpack.i.h.bf16 %v1747_v7  ;;  %v1748_v10 = vunpack.i.l.bf16 %v1747_v7  ;;  %v922_v11 = vsub.f32 %v828_v54, %v916_v8 }
 0x36c   : > { %v1619_v12 = vpack.c.bf16 %v1749_v9, %v1748_v10  ;;  %v928_v13 = vmul.f32 1.442695, %v922_v11 }
 0x36d   : > { %v919_v14 = vpop.xlane.xlu0 %918 }
 0x36e   : > { %1769 = vpow2.f32 %v928_v13  ;;  %v923_v15 = vsub.f32 %v904_v58, %v919_v14  ;;  %1620 = vmatpush3.bf16.msra.mxu0 %v1619_v12 }
 0x36f   : > { %1624 = vmatprep.subr.bf16.mxu0 %v1999_v0 }
 0x370   : > { %v930_v16 = vmul.f32 1.442695, %v923_v15 }
 0x372   : > { %1771 = vpow2.f32 %v930_v16 }
 0x374   : > { %v1768_v17 = vpop.eup %1767 }
 0x375   : > { %v935_v18 = vsel %vm907_vm4, %v1768_v17, 0.0 }
 0x376   : > { %936 = vadd.xlane.f32.xlu0 %v935_v18 }
 0x378   : > { %v1770_v19 = vpop.eup %1769 }
 0x379   : > { %v938_v20 = vsel %vm907_vm4, %v1770_v19, 0.0 }
 0x37a   : > { %939 = vadd.xlane.f32.xlu1 %v938_v20 }
 0x37c   : > { %v1772_v21 = vpop.eup %1771 }
 0x37d   : > { %v941_v22 = vsel %vm907_vm4, %v1772_v21, 0.0 }
 0x37e   : > { %942 = vadd.xlane.f32.xlu0 %v941_v22 }
 0x38b   : > { %1756 = vrot.lane.b32.xlu1 %v2357_v36, %s2005_s15 }
 0x38f   : > { %1761 = vrot.lane.b32.xlu1 %v2349_v29, %s2005_s15 }
 0x394   : > { %1751 = vrot.lane.b32.xlu0 %v2351_v30, %s2005_s15 }
 0x39a   : > { %v934_v23 = vpop.xlane.xlu1 %933 }
 0x39b   : > { %1773 = vrcp.f32 %v934_v23 }
 0x3a5   : > { %v1774_v24 = vpop.eup %1773 }
 0x3a6   : > { %v948_v25 = vmul.f32 %v1774_v24, %v1766_v2 }
 0x3a8   : > { %1565 = vmatmul.mubr.msk.f32.vlgmr.msra.gmra.mrb[6].mxu0 %vm907_vm4, %v948_v25 }
 0x3a9   : > { %1578 = vmatprep.mubr.msk.f32.mxu0 %vm2000_vm0, %v2001_v1 }
 0x403   : > { %v937_v26 = vpop.xlane.xlu0 %936 }
 0x404   : > { %1775 = vrcp.f32 %v937_v26 }
 0x407   : > { %v940_v27 = vpop.xlane.xlu1 %939 }
 0x408   : > { %1777 = vrcp.f32 %v940_v27 }
 0x40b   : > { %v1757_v28 = vpop.permute.xlu1 %1756  ;;  %v943_v31 = vpop.xlane.xlu0 %942 }
 0x40c   : > { %v1759_v32 = vunpack.i.h.bf16 %v1757_v28  ;;  %v1758_v29 = vunpack.i.l.bf16 %v1757_v28  ;;  %1779 = vrcp.f32 %v943_v31 }
 0x40e   : > { %v1625_v33 = vpack.c.bf16 %v1759_v32, %v1758_v29  ;;  %v1776_v37 = vpop.eup %1775 }
 0x40f   : > { %v1762_v30 = vpop.permute.xlu1 %1761  ;;  %v1752_v34 = vpop.permute.xlu0 %1751  ;;  %v949_v43 = vmul.f32 %v1776_v37, %v1768_v17 }
 0x410   : > { %v1754_v35 = vunpack.i.h.bf16 %v1752_v34  ;;  %v1753_v36 = vunpack.i.l.bf16 %v1752_v34  ;;  %1626 = vmatpush3.bf16.msra.mxu0 %v1625_v33  ;;  %v1764_v39 = vunpack.i.h.bf16 %v1762_v30  ;;  %v1763_v40 = vunpack.i.l.bf16 %v1762_v30 }
 0x412   : > { %v1778_v38 = vpop.eup %1777  ;;  %v1622_v41 = vpack.c.bf16 %v1754_v35, %v1753_v36  ;;  %v1628_v45 = vpack.c.bf16 %v1764_v39, %v1763_v40 }
 0x413   : > { %v950_v42 = vmul.f32 %v1778_v38, %v1770_v19 }
 0x414   : > { %1623 = vmatpush3.bf16.msra.mxu1 %v1622_v41 }
 0x415   : > { %1579 = vmatmul.mubr.msk.f32.vlgmr.msra.gmra.mrb[8].mxu0 %vm907_vm4, %v950_v42  ;;  %1627 = vmatprep.subr.bf16.mxu1 %v1999_v0 }
 0x416   : > { %v1780_v44 = vpop.eup %1779 }
 0x417   : > { %1572 = vmatmul.mubr.msk.f32.vlgmr.msra.gmra.mrb[6].mxu1 %vm907_vm4, %v949_v43  ;;  %v951_v46 = vmul.f32 %v1780_v44, %v1772_v21 }
 0x418   : > { %1629 = vmatpush3.bf16.msra.mxu1 %v1628_v45  ;;  %1585 = vmatprep.mubr.msk.f32.mxu1 %vm2000_vm0, %v2001_v1 }
 0x41b   : > { %1586 = vmatmul.mubr.msk.f32.vlgmr.msra.gmra.mrb[8].mxu1 %vm907_vm4, %v951_v46 }
 0x47b   : > { %v1027_v47 = vpop.f32.mrb[6].mxu0 }
 0x47c   : > { %v1566_v48 = vpop.f32.mrb[7].mxu0 }
 0x4e8   : > { %v1185_v49 = vpop.f32.mrb[8].mxu0 }
 0x4e9   : > { %1273 = vrot.lane.b32.xlu1 %v1185_v49, %s2006_s0  ;;  %v1580_v50 = vpop.f32.mrb[9].mxu0 }
 0x4ea   : > { %v1106_v0 = vpop.f32.mrb[6].mxu1 }
 0x4eb   : > { %1269 = vrot.lane.b32.xlu0 %v1106_v0, %s2007_s5  ;;  %v1573_v51 = vpop.f32.mrb[7].mxu1 }
 0x4ee   : > { %v1264_v52 = vpop.f32.mrb[8].mxu1 }
 0x4ef   : > { %1277 = vrot.lane.b32.xlu0 %v1264_v52, %s2008_s11  ;;  %v1587_v1 = vpop.f32.mrb[9].mxu1 }
 0x55b   : > { %v1274_v55 = vpop.permute.xlu1 %1273 }
 0x55d   : > { %v1270_v53 = vpop.permute.xlu0 %1269 }
 0x55e   : > { %v1280_v54 = vsel %vm602_vm2, %v1027_v47, %v1270_v53 }
 0x55f   : > { %v1281_v57 = vsel %vm907_vm4, %v1280_v54, %v1274_v55 }
 0x561   : > { %v1278_v56 = vpop.permute.xlu0 %1277 }
 0x562   : > { %v1283_v58 = vsel %vm1282_vm5, %v1281_v57, %v1278_v56 }
 0x563   : > { %1284 = vst.msk [vmem:[%s390_s30] sm:$0xff] %vm408_vm1, %v1283_v58 }
 0x564   : > { %1910 = shalt.err (!%p1907_p11)
}
 0x565   : > { %s1911_s12 = scalar_lea.hbm %s2418_s8, 128  ;;  %s1915_s10 = scalar_lea.hbm %s2475_s7, 256 }
 0x566   : > { %p1912_p1 = scmp.ne.s32.totalorder %s2418_s8, %s1911_s12  ;;  %p1916_p13 = scmp.lt.u32.totalorder %s2418_s8, %s2475_s7 }
 0x567   : > { %p1917_p0 = scmp.lt.u32.totalorder %s1915_s10, %s1911_s12  ;;  %p1919_p6 = scmp.lt.u32.totalorder %s1911_s12, %s2418_s8 }
 0x568   : > { %p1913_p8 = pnand %p1912_p1, %p2508_p10 }
 0x569   : > { %p1918_p2 = por %p1917_p0, %p1916_p13 }
 0x56a   : > { %p1914_p12 = pneg %p1913_p8 }
 0x56b   : > { %p1920_p3 = por %p1919_p6, %p1918_p2 }
 0x56d   : > { %p1921_p4 = pnand %p1920_p3, %p1914_p12 }
 0x56f   : > { %1924 = shalt.err (!%p1921_p4)
}
 0x570   : > { %1642 = dma.vmem_to_hbm [thread:$0]  (%p2508_p10), %s2420_s9, 128, %s2418_s8, %s1286_s27  }
 0x571 PF: > { %s2509_s5 = sld [smem:[#allocation16_spill]]  ;;  %s1312_s11 = sand.u32 1, %s1971_s24  }
 0x572   : > { %p2511_p5 = scmp.ge.s32.totalorder %s1991_s29, 2  ;;  %s1313_s16 = scalar_lea.sflag [#allocation4], %s1312_s11 }
 0x577   : > { %p2510_p9 = scmp.ne.s32.totalorder %s2509_s5, 0 }
 0x579   : > { %p1659_p7 = pnand %p2511_p5, %p2510_p9 }
 0x57b   : > { %1966 = dma.done.wait (!%p1659_p7), %s1313_s16, 128  }
 0x57c   : > { %1968 = vsyncadd (!%p1659_p7), %s1313_s16, 4294967168  ;;  %s27_s29 = sadd.s32 1, %s1991_s29   ;;  %s2512_s19 = sld [smem:[#allocation17_spill]] }
 0x57d   : > { %p24_p11 = scmp.ge.s32.totalorder %s27_s29, 4   ;;  %s2513_s24 = smov %s1975_s25 }
 0x57e   : > { %s2514_s25 = smov %s1979_s26  ;;  %s2515_s26 = smov %s2197_s23 }
 0x57f   : > { %s2516_s27 = smov %s1987_s28  ;;  %26 = sbr.rel (!%p24_p11) target bundleno = 13 (0xd), region = 117 }
 0x582   : > { %s2517_s28 = smov %s2512_s19 }
 0x586   :  { %1318 = vsyncpa [#allocation3], 1 }
 0x587   :  { %1320 = vsyncpa [#allocation3 + $0x1], 1 }
 0x588   :  { %1321 = vsyncpa [#allocation6], 1 }
 0x589   :  { %1323 = vsyncpa [#allocation6 + $0x1], 1 }
 0x58a   :  { %1324 = vsyncpa [#allocation9], 1 }
 0x58b   :  { %1325 = vsyncpa [#allocation4], 1 }
 0x58c   :  { %1327 = vsyncpa [#allocation4 + $0x1], 1 }

</bundles_post_ra>
